<compile_context>
chip_gen: v7x
topology: tpu7x:2x2x1
jax: 0.10.0
libtpu: 0.0.40
codegen_flags: <defaults>
</compile_context>

<pallas_src>
import jax
import jax.numpy as jnp
from jax.experimental import pallas as pl
from jax.experimental.pallas import tpu as pltpu

_SUBLANE = 8
_LANE = 128


def _round_up(x, m):
    return ((x + m - 1) // m) * m


# --------------------------------------------------------------------------
# Kernel
# --------------------------------------------------------------------------
def mappo_kernel(x_ref, w1_ref, b1_ref, w2_ref, b2_ref, wh_ref, bh_ref, out_ref):
    # x arrives in its HBM dtype (bf16 or f32); cast per-tile (no-op for bf16).
    x = x_ref[...].astype(jnp.bfloat16)                   # (tile_b, flat_dim)

    # fc1: bf16 MXU operands, f32 accumulation, f32 bias/ReLU epilogue
    h1 = jnp.dot(x, w1_ref[...], preferred_element_type=jnp.float32)
    h1 = jnp.maximum(h1 + b1_ref[...], 0.0)               # (tile_b, 128) f32

    # fc2
    h2 = jnp.dot(h1.astype(jnp.bfloat16), w2_ref[...],
                 preferred_element_type=jnp.float32)
    h2 = jnp.maximum(h2 + b2_ref[...], 0.0)               # (tile_b, 64) f32

    # fused action+value head -> lane-dense 128-wide bf16 slab
    out = jnp.dot(h2.astype(jnp.bfloat16), wh_ref[...],
                  preferred_element_type=jnp.float32) + bh_ref[...]
    out_ref[...] = out.astype(out_ref.dtype)


# --------------------------------------------------------------------------
# Parameter preparation (do ONCE, not per call)
# --------------------------------------------------------------------------
def prepare_params(params):
    """Convert f32 PyTorch-style params into the fused / bf16 kernel format."""
    w1, b1, w2, b2, wa, ba, wv, bv = params
    action_dim = wa.shape[1]
    head_dim = action_dim + 1                       # logits + value
    head_pad = _round_up(max(head_dim, _LANE), _LANE)

    wh = jnp.zeros((wa.shape[0], head_pad), jnp.float32)
    wh = wh.at[:, :action_dim].set(wa)
    wh = wh.at[:, action_dim:head_dim].set(wv)
    bh = jnp.zeros((1, head_pad), jnp.float32)
    bh = bh.at[:, :action_dim].set(ba)
    bh = bh.at[:, action_dim:head_dim].set(bv)

    kparams = (w1.astype(jnp.bfloat16), b1,          # biases stay f32
               w2.astype(jnp.bfloat16), b2,
               wh.astype(jnp.bfloat16), bh)
    return kparams, action_dim, head_pad


# --------------------------------------------------------------------------
# VMEM-aware batch tiling
# --------------------------------------------------------------------------
def _derive_batch_tiling(B, flat_dim, x_itemsize, head_pad, out_itemsize,
                         weight_bytes):
    """tile_b such that (2 x x-tile + 2 x out-tile + resident weights) fits a
    ~24 MiB budget -> safe inside v7x's 64 MiB physical VMEM and leaves
    headroom under the 32 MiB scoped limit on every generation."""
    budget = 24 * 1024 * 1024
    per_row = 2 * flat_dim * x_itemsize + 2 * head_pad * out_itemsize
    avail = max(budget - weight_bytes, per_row * _SUBLANE)
    cap = max(_SUBLANE, min(2048, (avail // per_row) // _SUBLANE * _SUBLANE))

    if B <= _SUBLANE:
        # Single whole-array block (block dim == full array dim is layout-legal).
        return B, 1

    # >= 2 tiles when possible so v7x's two TensorCores both get work; each
    # tile is a multiple of 8 rows, the last block may be partial (masked).
    num_tiles = max(2, pl.cdiv(B, cap))
    tile_b = min(cap, _round_up(pl.cdiv(B, num_tiles), _SUBLANE))
    return tile_b, pl.cdiv(B, tile_b)


# --------------------------------------------------------------------------
# Wrapper
# --------------------------------------------------------------------------
def mappo_forward(obs, kparams, action_dim):
    """obs: (B, C, H, W) or (B, flat_dim), any float dtype (bf16 preferred).
    Returns (logits (B, A) f32, value (B, 1) f32)."""
    x = obs.reshape(obs.shape[0], -1) if obs.ndim > 2 else obs
    # NOTE: no wrapper-side astype / pad pass over x -- it streams in its
    # native dtype and is cast per-tile inside the kernel.

    w1, b1, w2, b2, wh, bh = kparams
    B, flat_dim = x.shape
    head_pad = wh.shape[1]

    out_dtype = jnp.bfloat16
    weight_bytes = 2 * sum(int(a.size) * a.dtype.itemsize for a in kparams)
    tile_b, num_tiles = _derive_batch_tiling(
        B, flat_dim, x.dtype.itemsize, head_pad,
        jnp.dtype(out_dtype).itemsize, weight_bytes)

    const2d = lambda i: (0, 0)   # weights/biases: one block, VMEM-resident

    out = pl.pallas_call(
        mappo_kernel,
        out_shape=jax.ShapeDtypeStruct((B, head_pad), out_dtype),
        grid=(num_tiles,),
        in_specs=[
            pl.BlockSpec((tile_b, flat_dim), lambda i: (i, 0)),   # x tiles
            pl.BlockSpec(w1.shape, const2d),
            pl.BlockSpec(b1.shape, const2d),
            pl.BlockSpec(w2.shape, const2d),
            pl.BlockSpec(b2.shape, const2d),
            pl.BlockSpec(wh.shape, const2d),
            pl.BlockSpec(bh.shape, const2d),
        ],
        out_specs=pl.BlockSpec((tile_b, head_pad), lambda i: (i, 0)),
        compiler_params=pltpu.CompilerParams(
            # batch axis is independent across tiles -> shard across TCs
            dimension_semantics=("parallel",),
            vmem_limit_bytes=32 * 1024 * 1024,   # above v5e's 16 MiB default
        ),
    )(x, w1, b1, w2, b2, wh, bh)

    # Tiny slices (B x A, B x 1) -- negligible traffic vs. the slab write.
    logits = out[:, :action_dim].astype(jnp.float32)
    value = out[:, action_dim:action_dim + 1].astype(jnp.float32)
    return logits, value


# --------------------------------------------------------------------------
# Init + reference
# --------------------------------------------------------------------------
def init_params(key, flat_dim, action_dim):
    """Deterministic PyTorch-style (uniform fan-in) init. Weights are (in, out)."""
    def linear_init(k, fan_in, fan_out):
        kw, kb = jax.random.split(k)
        bound = 1.0 / jnp.sqrt(jnp.float32(fan_in))
        w = jax.random.uniform(kw, (fan_in, fan_out), jnp.float32, -bound, bound)
        b = jax.random.uniform(kb, (1, fan_out), jnp.float32, -bound, bound)
        return w, b

    k1, k2, k3, k4 = jax.random.split(key, 4)
    w1, b1 = linear_init(k1, flat_dim, 128)
    w2, b2 = linear_init(k2, 128, 64)
    wa, ba = linear_init(k3, 64, action_dim)
    wv, bv = linear_init(k4, 64, 1)
    return (w1, b1, w2, b2, wa, ba, wv, bv)


def reference_forward(obs, params):
    """Plain-JAX reference using the same bf16-operand / f32-accumulate math."""
    x = obs.reshape(obs.shape[0], -1) if obs.ndim > 2 else obs
    w1, b1, w2, b2, wa, ba, wv, bv = params

    def mm(a, w):
        return jnp.dot(a.astype(jnp.bfloat16), w.astype(jnp.bfloat16),
                       preferred_element_type=jnp.float32)

    h1 = jnp.maximum(mm(x, w1) + b1, 0.0)
    h2 = jnp.maximum(mm(h1, w2) + b2, 0.0)
    return mm(h2, wa) + ba, mm(h2, wv) + bv


# --------------------------------------------------------------------------
# Smoke test
# --------------------------------------------------------------------------
if __name__ == "__main__":
    key = jax.random.PRNGKey(0)
    k_obs, k_obs2, k_params = jax.random.split(key, 3)

    # obs_shape = (4, 16, 16) -> flat_dim = 1024; action_dim = 8
    B, C, H, W = 2, 4, 16, 16
    action_dim = 8
    flat_dim = C * H * W

    params = init_params(k_params, flat_dim, action_dim)
    kparams, a_dim, _ = prepare_params(params)

    # --- bf16 observations (recommended storage: halves the dominant x DMA) ---
    obs = jax.random.normal(k_obs, (B, C, H, W), dtype=jnp.float32).astype(jnp.bfloat16)
    logits, value = mappo_forward(obs, kparams, a_dim)
    logits = jax.block_until_ready(logits)
    value = jax.block_until_ready(value)
    ref_logits, ref_value = reference_forward(obs, params)
    assert logits.shape == (B, action_dim)
    assert value.shape == (B, 1)
    assert jnp.allclose(logits, ref_logits, atol=1e-2, rtol=1e-2)
    assert jnp.allclose(value, ref_value, atol=1e-2, rtol=1e-2)

    # --- f32 observations, multi-tile grid with a partial last block ---------
    B2 = 20
    obs2 = jax.random.normal(k_obs2, (B2, C, H, W), dtype=jnp.float32)
    logits2, value2 = mappo_forward(obs2, kparams, a_dim)
    logits2 = jax.block_until_ready(logits2)
    value2 = jax.block_until_ready(value2)
    ref_logits2, ref_value2 = reference_forward(obs2, params)
    assert logits2.shape == (B2, action_dim)
    assert value2.shape == (B2, 1)
    assert jnp.allclose(logits2, ref_logits2, atol=1e-2, rtol=1e-2)
    assert jnp.allclose(value2, ref_value2, atol=1e-2, rtol=1e-2)

    print("KERNEL_OK")
</pallas_src>

<mosaic_0001>
module attributes {stable_mosaic.version = 11 : i64} {
  func.func @mappo_kernel(%arg0: i32, %arg1: memref<2x1024xbf16, #tpu.memory_space<vmem>>, %arg2: memref<1024x128xbf16, #tpu.memory_space<vmem>>, %arg3: memref<1x128xf32, #tpu.memory_space<vmem>>, %arg4: memref<128x64xbf16, #tpu.memory_space<vmem>>, %arg5: memref<1x64xf32, #tpu.memory_space<vmem>>, %arg6: memref<64x128xbf16, #tpu.memory_space<vmem>>, %arg7: memref<1x128xf32, #tpu.memory_space<vmem>>, %arg8: memref<2x128xbf16, #tpu.memory_space<vmem>>) attributes {dimension_semantics = [#tpu.dimension_semantics<parallel>], iteration_bounds = array<i64: 1>, scalar_prefetch = 0 : i64, scratch_operands = 0 : i64, tpu.core_type = #tpu.core_type<tc>, window_params = [{transform_indices = @transform_0, window_bounds = array<i64: 2, 1024>}, {pipeline_mode = #tpu.pipeline_mode<synchronous>, transform_indices = @transform_1, window_bounds = array<i64: 1024, 128>}, {pipeline_mode = #tpu.pipeline_mode<synchronous>, transform_indices = @transform_2, window_bounds = array<i64: 1, 128>}, {pipeline_mode = #tpu.pipeline_mode<synchronous>, transform_indices = @transform_3, window_bounds = array<i64: 128, 64>}, {pipeline_mode = #tpu.pipeline_mode<synchronous>, transform_indices = @transform_4, window_bounds = array<i64: 1, 64>}, {pipeline_mode = #tpu.pipeline_mode<synchronous>, transform_indices = @transform_5, window_bounds = array<i64: 64, 128>}, {pipeline_mode = #tpu.pipeline_mode<synchronous>, transform_indices = @transform_6, window_bounds = array<i64: 1, 128>}, {transform_indices = @transform_7, window_bounds = array<i64: 2, 128>}]} {
    %c0 = arith.constant 0 : index
    %c0_0 = arith.constant 0 : index
    %0 = vector.load %arg1[%c0, %c0_0] : memref<2x1024xbf16, #tpu.memory_space<vmem>>, vector<2x1024xbf16>
    %c0_1 = arith.constant 0 : index
    %c0_2 = arith.constant 0 : index
    %1 = vector.load %arg2[%c0_1, %c0_2] : memref<1024x128xbf16, #tpu.memory_space<vmem>>, vector<1024x128xbf16>
    %cst = arith.constant dense<0.000000e+00> : vector<2x128xf32>
    %2 = tpu.matmul %0, %1, %cst {dimension_numbers = #tpu.dot_dimension_numbers<[1], [0], [0], [1], [0, 0, 1, 1], [], []>} : vector<2x1024xbf16>, vector<1024x128xbf16>, vector<2x128xf32> -> vector<2x128xf32>
    %c0_3 = arith.constant 0 : index
    %c0_4 = arith.constant 0 : index
    %3 = vector.load %arg3[%c0_3, %c0_4] : memref<1x128xf32, #tpu.memory_space<vmem>>, vector<1x128xf32>
    %4 = vector.broadcast %3 : vector<1x128xf32> to vector<2x128xf32>
    %5 = arith.addf %2, %4 : vector<2x128xf32>
    %cst_5 = arith.constant 0.000000e+00 : f32
    %6 = vector.broadcast %cst_5 : f32 to vector<2x128xf32>
    %7 = arith.maximumf %5, %6 : vector<2x128xf32>
    %8 = arith.truncf %7 : vector<2x128xf32> to vector<2x128xbf16>
    %c0_6 = arith.constant 0 : index
    %c0_7 = arith.constant 0 : index
    %9 = vector.load %arg4[%c0_6, %c0_7] : memref<128x64xbf16, #tpu.memory_space<vmem>>, vector<128x64xbf16>
    %cst_8 = arith.constant dense<0.000000e+00> : vector<2x64xf32>
    %10 = tpu.matmul %8, %9, %cst_8 {dimension_numbers = #tpu.dot_dimension_numbers<[1], [0], [0], [1], [0, 0, 1, 1], [], []>} : vector<2x128xbf16>, vector<128x64xbf16>, vector<2x64xf32> -> vector<2x64xf32>
    %c0_9 = arith.constant 0 : index
    %c0_10 = arith.constant 0 : index
    %11 = vector.load %arg5[%c0_9, %c0_10] : memref<1x64xf32, #tpu.memory_space<vmem>>, vector<1x64xf32>
    %12 = vector.broadcast %11 : vector<1x64xf32> to vector<2x64xf32>
    %13 = arith.addf %10, %12 : vector<2x64xf32>
    %cst_11 = arith.constant 0.000000e+00 : f32
    %14 = vector.broadcast %cst_11 : f32 to vector<2x64xf32>
    %15 = arith.maximumf %13, %14 : vector<2x64xf32>
    %16 = arith.truncf %15 : vector<2x64xf32> to vector<2x64xbf16>
    %c0_12 = arith.constant 0 : index
    %c0_13 = arith.constant 0 : index
    %17 = vector.load %arg6[%c0_12, %c0_13] : memref<64x128xbf16, #tpu.memory_space<vmem>>, vector<64x128xbf16>
    %cst_14 = arith.constant dense<0.000000e+00> : vector<2x128xf32>
    %18 = tpu.matmul %16, %17, %cst_14 {dimension_numbers = #tpu.dot_dimension_numbers<[1], [0], [0], [1], [0, 0, 1, 1], [], []>} : vector<2x64xbf16>, vector<64x128xbf16>, vector<2x128xf32> -> vector<2x128xf32>
    %c0_15 = arith.constant 0 : index
    %c0_16 = arith.constant 0 : index
    %19 = vector.load %arg7[%c0_15, %c0_16] : memref<1x128xf32, #tpu.memory_space<vmem>>, vector<1x128xf32>
    %20 = vector.broadcast %19 : vector<1x128xf32> to vector<2x128xf32>
    %21 = arith.addf %18, %20 : vector<2x128xf32>
    %22 = arith.truncf %21 : vector<2x128xf32> to vector<2x128xbf16>
    %c0_17 = arith.constant 0 : index
    %c0_18 = arith.constant 0 : index
    %23 = vector.load %arg8[%c0_17, %c0_18] : memref<2x128xbf16, #tpu.memory_space<vmem>>, vector<2x128xbf16>
    tpu.vector_store %arg8[%c0_17, %c0_18], %22 {strides = array<i32>} : memref<2x128xbf16, #tpu.memory_space<vmem>>, vector<2x128xbf16>,
    return
  }
  func.func @transform_0(%arg0: i32) -> (i32, i32) {
    %c0_i32 = arith.constant 0 : i32
    %c0_i32_0 = arith.constant 0 : i32
    return %arg0, %c0_i32 : i32, i32
  }
  func.func @transform_1(%arg0: i32) -> (i32, i32) {
    %c0_i32 = arith.constant 0 : i32
    %c0_i32_0 = arith.constant 0 : i32
    %c0_i32_1 = arith.constant 0 : i32
    return %c0_i32, %c0_i32_0 : i32, i32
  }
  func.func @transform_2(%arg0: i32) -> (i32, i32) {
    %c0_i32 = arith.constant 0 : i32
    %c0_i32_0 = arith.constant 0 : i32
    %c0_i32_1 = arith.constant 0 : i32
    return %c0_i32, %c0_i32_0 : i32, i32
  }
  func.func @transform_3(%arg0: i32) -> (i32, i32) {
    %c0_i32 = arith.constant 0 : i32
    %c0_i32_0 = arith.constant 0 : i32
    %c0_i32_1 = arith.constant 0 : i32
    return %c0_i32, %c0_i32_0 : i32, i32
  }
  func.func @transform_4(%arg0: i32) -> (i32, i32) {
    %c0_i32 = arith.constant 0 : i32
    %c0_i32_0 = arith.constant 0 : i32
    %c0_i32_1 = arith.constant 0 : i32
    return %c0_i32, %c0_i32_0 : i32, i32
  }
  func.func @transform_5(%arg0: i32) -> (i32, i32) {
    %c0_i32 = arith.constant 0 : i32
    %c0_i32_0 = arith.constant 0 : i32
    %c0_i32_1 = arith.constant 0 : i32
    return %c0_i32, %c0_i32_0 : i32, i32
  }
  func.func @transform_6(%arg0: i32) -> (i32, i32) {
    %c0_i32 = arith.constant 0 : i32
    %c0_i32_0 = arith.constant 0 : i32
    %c0_i32_1 = arith.constant 0 : i32
    return %c0_i32, %c0_i32_0 : i32, i32
  }
  func.func @transform_7(%arg0: i32) -> (i32, i32) {
    %c0_i32 = arith.constant 0 : i32
    %c0_i32_0 = arith.constant 0 : i32
    return %arg0, %c0_i32 : i32, i32
  }
}

</mosaic_0001>

<bundles_post_ra>
// kernel: tpu_custom_call.1
= control target key start
LH: loop header
LB: loop body
LE: loop exit
PB: predicated region body
PF: predicated region fallthrough
CT: control target
= control target key end

     0   :  { %12 = vsyncpa [#allocation3], 0  ;;  %s1487_s0 = inlined_call_operand.vmem [shape: bf16[2,1024], index: 0, kind: input, shape index: {}]   ;;  %s1488_s1 = inlined_call_operand.hbm [shape: bf16[1024,128], index: 1, kind: input, shape index: {}]   ;;  %s1489_s2 = inlined_call_operand.vmem [shape: f32[1,128], index: 2, kind: input, shape index: {}]   ;;  %s1490_s3 = inlined_call_operand.vmem [shape: bf16[128,64], index: 3, kind: input, shape index: {}]   ;;  %s1491_s4 = inlined_call_operand.vmem [shape: f32[1,64], index: 4, kind: input, shape index: {}]   ;;  %s1492_s5 = inlined_call_operand.vmem [shape: bf16[64,128], index: 5, kind: input, shape index: {}]   ;;  %s1493_s6 = inlined_call_operand.vmem [shape: f32[1,128], index: 6, kind: input, shape index: {}]   ;;  %s1494_s7 = inlined_call_operand.hbm [shape: bf16[2,128], index: 7, kind: output, shape index: {}]  }
   0x1   :  { %13 = vsyncpa [#allocation4], 0  ;;  %s1341_s24 = smov [#allocation2]   ;;  %s1293_s28 = scalar_lea.hbm %s1488_s1, 8192 }
   0x2   :  { %s21_s25 = sshll.u32 %s1341_s24, 4  ;;  %p1294_p0 = scmp.ne.s32.totalorder %s1488_s1, %s1293_s28  ;;  %s22_s25 = int_to_ptr.vmem [resolvable:$true] %s21_s25 }
   0x3   :  { %p1297_p1 = scmp.lt.u32.totalorder %s1293_s28, %s1488_s1 }
   0x5   :  { %p1299_p2 = pnand %p1297_p1, %p1294_p0 }
   0x7   :  { %1302 = shalt.err (!%p1299_p2)
}
   0x8   :  { %s1303_s10 = scalar_lea.vmem %s22_s25, 8192  ;;  %p1308_p4 = scmp.lt.s32.totalorder %s22_s25, %s22_s25 }
   0x9   :  { %p1304_p3 = scmp.ne.s32.totalorder %s22_s25, %s1303_s10  ;;  %p1309_p5 = scmp.lt.s32.totalorder %s1303_s10, %s1303_s10 }
   0xb   :  { %p1310_p6 = por %p1309_p5, %p1308_p4 }
   0xd   :  { %p1311_p7 = pnand %p1310_p6, %p1304_p3 }
   0xf   :  { %1314 = shalt.err (!%p1311_p7)
}
  0x10   :  { %s1342_s11 = smov 64   ;;  %s1343_s12 = smov 4  }
  0x11   :  { %27 = dma.hbm_to_vmem [thread:$0]  %s1488_s1, 8192, %s22_s25, [#allocation3], %s1342_s11, %s1342_s11, %s1343_s12  }
  0x12   :  { %1337 = dma.done.wait [#allocation3], 8192  }
  0x13   :  { %1338 = vsyncadd [#allocation3], 4294959104  ;;  %v1216_v0 = vld [vmem:[#allocation2 + $0x40] sm:$0xff]   ;;  %v1220_v4 = vld [vmem:[#allocation2 + $0x48] sm:$0xff]   ;;  %v1344_v22 = vmov 1966171168   ;;  %v183_v24 = vlaneseq }
  0x14   :  { %v1217_v1 = vld [vmem:[#allocation2 + $0xc0] sm:$0xff]   ;;  %1075 = vmatprep.subr.bf16.mxu0 %v1216_v0  ;;  %v1221_v5 = vld [vmem:[#allocation2 + $0xc8] sm:$0xff]   ;;  %v1224_v8 = vld [vmem:[#allocation2 + $0x50] sm:$0xff]   ;;  %v181_v23 = vunpack.c.l.s4 %v1344_v22  ;;  %vm1346_vm0 = vmmov 0   ;;  %vm934_vm1 = vcmask 523264  }
  0x15   :  { %v1218_v2 = vld [vmem:[#allocation2] sm:$0xff]   ;;  %1097 = vmatprep.subr.bf16.mxu1 %v1217_v1  ;;  %v1222_v6 = vld [vmem:[#allocation2 + $0x8] sm:$0xff]   ;;  %v1225_v9 = vld [vmem:[#allocation2 + $0xd0] sm:$0xff]   ;;  %v184_v30 = vshrl.u32 %v183_v24, 7 }
  0x16   :  { %v1219_v3 = vld [vmem:[#allocation2 + $0x80] sm:$0xff]   ;;  %1076 = vmatpush3.bf16.msra.mxu0 %v1218_v2  ;;  %v1223_v7 = vld [vmem:[#allocation2 + $0x88] sm:$0xff]   ;;  %v1226_v10 = vld [vmem:[#allocation2 + $0x10] sm:$0xff]   ;;  %v182_v29 = vunpack.c.0.s8 %v181_v23 }
  0x17   :  { %1098 = vmatpush3.bf16.msra.mxu1 %v1219_v3  ;;  %1077 = vmatprep.subr.bf16.mxu0 %v1220_v4  ;;  %v1227_v11 = vld [vmem:[#allocation2 + $0x90] sm:$0xff]   ;;  %v1228_v12 = vld [vmem:[#allocation2 + $0x58] sm:$0xff]   ;;  %v1232_v16 = vld [vmem:[#allocation2 + $0x60] sm:$0xff]  }
  0x18   :  { %1099 = vmatprep.subr.bf16.mxu1 %v1221_v5  ;;  %v1229_v13 = vld [vmem:[#allocation2 + $0xd8] sm:$0xff]   ;;  %v1233_v17 = vld [vmem:[#allocation2 + $0xe0] sm:$0xff]   ;;  %v1236_v20 = vld [vmem:[#allocation2 + $0x68] sm:$0xff]   ;;  %v1400_v35 = vsub.s32 %v182_v29, %v184_v30 }
  0x19   :  { %v1230_v14 = vld [vmem:[#allocation2 + $0x18] sm:$0xff]   ;;  %v1234_v18 = vld [vmem:[#allocation2 + $0x20] sm:$0xff]   ;;  %v1237_v21 = vld [vmem:[#allocation2 + $0xe8] sm:$0xff]  }
  0x1a   :  { %1078 = vmatpush3.bf16.msra.mxu0 %v1222_v6  ;;  %v1231_v15 = vld [vmem:[#allocation2 + $0x98] sm:$0xff]   ;;  %v1235_v19 = vld [vmem:[#allocation2 + $0xa0] sm:$0xff]   ;;  %v1238_v25 = vld [vmem:[#allocation2 + $0x28] sm:$0xff]  }
  0x1b   :  { %1100 = vmatpush3.bf16.msra.mxu1 %v1223_v7  ;;  %1079 = vmatprep.subr.bf16.mxu0 %v1224_v8  ;;  %v1239_v26 = vld [vmem:[#allocation2 + $0xa8] sm:$0xff]   ;;  %v1240_v27 = vld [vmem:[#allocation2 + $0x70] sm:$0xff]   ;;  %v1244_v33 = vld [vmem:[#allocation2 + $0x78] sm:$0xff]  }
  0x1c   :  { %1101 = vmatprep.subr.bf16.mxu1 %v1225_v9  ;;  %v1241_v28 = vld [vmem:[#allocation2 + $0xf0] sm:$0xff]   ;;  %v1245_v34 = vld [vmem:[#allocation2 + $0xf8] sm:$0xff]   ;;  %v42_v38 = vld [vmem:[%s1487_s0] sm:$0xff] }
  0x1d   :  { %v1242_v31 = vld [vmem:[#allocation2 + $0x30] sm:$0xff]   ;;  %v1246_v36 = vld [vmem:[#allocation2 + $0x38] sm:$0xff]   ;;  %v179_v39 = vcombine.high %v42_v38, %v42_v38  ;;  %v186_v40 = vrot.slane %v42_v38, %v1400_v35  ;;  %v1249_v41 = vld [vmem:[#allocation2 + $0x140] sm:$0xff]  }
  0x1e   :  { %1080 = vmatpush3.bf16.msra.mxu0 %v1226_v10  ;;  %v1243_v32 = vld [vmem:[#allocation2 + $0xb0] sm:$0xff]   ;;  %v1247_v37 = vld [vmem:[#allocation2 + $0xb8] sm:$0xff]   ;;  %v1250_v42 = vld [vmem:[#allocation2 + $0x1c0] sm:$0xff]  }
  0x1f   :  { %1102 = vmatpush3.bf16.msra.mxu1 %v1227_v11  ;;  %1081 = vmatprep.subr.bf16.mxu0 %v1228_v12  ;;  %v194_v43 = vcombine.high %v186_v40, %v186_v40  ;;  %v202_v44 = vrot.slane %v186_v40, %v1400_v35  ;;  %v1408_v45 = vrot.slane %v179_v39, %v1400_v35  ;;  %v1251_v46 = vld [vmem:[#allocation2 + $0x100] sm:$0xff]   ;;  %v1253_v51 = vld [vmem:[#allocation2 + $0x148] sm:$0xff]   ;;  %v1257_v58 = vld [vmem:[#allocation2 + $0x150] sm:$0xff]  }
  0x20   :  { %1103 = vmatprep.subr.bf16.mxu1 %v1229_v13  ;;  %v1252_v48 = vld [vmem:[#allocation2 + $0x180] sm:$0xff]   ;;  %v1254_v53 = vld [vmem:[#allocation2 + $0x1c8] sm:$0xff]   ;;  %v1258_v59 = vld [vmem:[#allocation2 + $0x1d0] sm:$0xff]  }
  0x21   :  { %v216_v47 = vrot.slane %v194_v43, %v1400_v35  ;;  %v195_v49 = vcombine.high %v1408_v45, %v1408_v45  ;;  %v224_v50 = vcombine.high %v202_v44, %v202_v44  ;;  %v1255_v55 = vld [vmem:[#allocation2 + $0x108] sm:$0xff]   ;;  %v1259_v60 = vld [vmem:[#allocation2 + $0x110] sm:$0xff]   ;;  %v1261_v62 = vld [vmem:[#allocation2 + $0x158] sm:$0xff]  }
  0x22   :  { %1082 = vmatpush3.bf16.msra.mxu0 %v1230_v14  ;;  %v1256_v56 = vld [vmem:[#allocation2 + $0x188] sm:$0xff]   ;;  %v1260_v61 = vld [vmem:[#allocation2 + $0x190] sm:$0xff]   ;;  %v1262_v63 = vld [vmem:[#allocation2 + $0x1d8] sm:$0xff]  }
  0x23   :  { %1104 = vmatpush3.bf16.msra.mxu1 %v1231_v15  ;;  %1083 = vmatprep.subr.bf16.mxu0 %v1232_v16  ;;  %v226_v52 = vcombine.high %v216_v47, %v216_v47  ;;  %v223_v54 = vrot.slane %v195_v49, %v1400_v35  ;;  %v1263_v0 = vld [vmem:[#allocation2 + $0x118] sm:$0xff]   ;;  %v1265_v2 = vld [vmem:[#allocation2 + $0x160] sm:$0xff]   ;;  %v1269_v6 = vld [vmem:[#allocation2 + $0x168] sm:$0xff]  }
  0x24   :  { %1105 = vmatprep.subr.bf16.mxu1 %v1233_v17  ;;  %652 = vmatprep.mubr.bf16.mxu0 %v216_v47  ;;  %v1264_v1 = vld [vmem:[#allocation2 + $0x198] sm:$0xff]   ;;  %v1266_v3 = vld [vmem:[#allocation2 + $0x1e0] sm:$0xff]   ;;  %v1270_v7 = vld [vmem:[#allocation2 + $0x1e8] sm:$0xff]  }
  0x25   :  { %692 = vmatprep.mubr.bf16.mxu1 %v226_v52  ;;  %v227_v57 = vcombine.high %v223_v54, %v223_v54  ;;  %v1267_v4 = vld [vmem:[#allocation2 + $0x120] sm:$0xff]   ;;  %v1271_v8 = vld [vmem:[#allocation2 + $0x128] sm:$0xff]   ;;  %v1273_v10 = vld [vmem:[#allocation2 + $0x170] sm:$0xff]  }
  0x26   :  { %1084 = vmatpush3.bf16.msra.mxu0 %v1234_v18  ;;  %v1268_v5 = vld [vmem:[#allocation2 + $0x1a0] sm:$0xff]   ;;  %v1272_v9 = vld [vmem:[#allocation2 + $0x1a8] sm:$0xff]   ;;  %v1274_v11 = vld [vmem:[#allocation2 + $0x1f0] sm:$0xff]   ;;  %v209_v18 = vrot.slane %v1408_v45, %v1400_v35 }
  0x27   :  { %1106 = vmatpush3.bf16.msra.mxu1 %v1235_v19  ;;  %1085 = vmatprep.subr.bf16.mxu0 %v1236_v20  ;;  %v1275_v12 = vld [vmem:[#allocation2 + $0x130] sm:$0xff]   ;;  %v1277_v14 = vld [vmem:[#allocation2 + $0x178] sm:$0xff]   ;;  %v1281_v20 = vld [vmem:[%s1490_s3] sm:$0xff]  }
  0x28   :  { %1107 = vmatprep.subr.bf16.mxu1 %v1237_v21  ;;  %v1276_v13 = vld [vmem:[#allocation2 + $0x1b0] sm:$0xff]   ;;  %v1278_v15 = vld [vmem:[#allocation2 + $0x1f8] sm:$0xff]   ;;  %v225_v19 = vcombine.high %v209_v18, %v209_v18  ;;  %v1345_v21 = vmov 0.0   ;;  %v1282_v22 = vld [vmem:[%s1490_s3 + $0x8] sm:$0xff]  }
  0x29   :  { %v1279_v16 = vld [vmem:[#allocation2 + $0x138] sm:$0xff]   ;;  %v1283_v23 = vld [vmem:[%s1490_s3 + $0x10] sm:$0xff]   ;;  %v1289_v29 = vld [vmem:[%s1492_s5] sm:$0xff]  }
  0x2a   :  { %1086 = vmatpush3.bf16.msra.mxu0 %v1238_v25  ;;  %v1280_v17 = vld [vmem:[#allocation2 + $0x1b8] sm:$0xff]   ;;  %v1285_v25 = vld [vmem:[%s1490_s3 + $0x20] sm:$0xff]   ;;  %v1290_v30 = vld [vmem:[%s1492_s5 + $0x8] sm:$0xff]  }
  0x2b   :  { %1108 = vmatpush3.bf16.msra.mxu1 %v1239_v26  ;;  %1087 = vmatprep.subr.bf16.mxu0 %v1240_v27  ;;  %v1284_v24 = vld [vmem:[%s1490_s3 + $0x18] sm:$0xff]   ;;  %v1286_v26 = vld [vmem:[%s1490_s3 + $0x28] sm:$0xff]   ;;  %v1287_v27 = vld [vmem:[%s1490_s3 + $0x30] sm:$0xff]  }
  0x2c   :  { %1109 = vmatprep.subr.bf16.mxu1 %v1241_v28  ;;  %v1288_v28 = vld [vmem:[%s1490_s3 + $0x38] sm:$0xff]  }
  0x2e   :  { %1088 = vmatpush3.bf16.msra.mxu0 %v1242_v31 }
  0x2f   :  { %1110 = vmatpush3.bf16.msra.mxu1 %v1243_v32  ;;  %1089 = vmatprep.subr.bf16.mxu0 %v1244_v33  ;;  %v995_v32 = vld [vmem:[%s1489_s2] ss:$0 sm:$0xff] }
  0x30   :  { %1111 = vmatprep.subr.bf16.mxu1 %v1245_v34 }
  0x32   :  { %1090 = vmatpush3.bf16.msra.mxu0 %v1246_v36 }
  0x33   :  { %1112 = vmatpush3.bf16.msra.mxu1 %v1247_v37  ;;  %1119 = vmatprep.subr.bf16.mxu0 %v1249_v41 }
  0x34   :  { %1141 = vmatprep.subr.bf16.mxu1 %v1250_v42 }
  0x35   :  { %653 = vmatmul.mubr.bf16.vlgmr.msra.gmra.mrb[0].mxu0 %v202_v44 }
  0x36   :  { %1120 = vmatpush3.bf16.msra.mxu0 %v1251_v46  ;;  %693 = vmatmul.mubr.bf16.vlgmr.msra.gmra.mrb[0].mxu1 %v224_v50 }
  0x37   :  { %1121 = vmatprep.subr.bf16.mxu0 %v1253_v51  ;;  %1142 = vmatpush3.bf16.msra.mxu1 %v1252_v48 }
  0x38   :  { %732 = vmatprep.mubr.bf16.mxu0 %v223_v54  ;;  %1143 = vmatprep.subr.bf16.mxu1 %v1254_v53 }
  0x39   :  { %772 = vmatprep.mubr.bf16.mxu1 %v227_v57 }
  0x3a   :  { %1122 = vmatpush3.bf16.msra.mxu0 %v1255_v55 }
  0x3b   :  { %1123 = vmatprep.subr.bf16.mxu0 %v1257_v58  ;;  %1144 = vmatpush3.bf16.msra.mxu1 %v1256_v56  ;;  %v1291_v58 = vld [vmem:[%s1492_s5 + $0x10] sm:$0xff]  }
  0x3c   :  { %1145 = vmatprep.subr.bf16.mxu1 %v1258_v59  ;;  %v1292_v59 = vld [vmem:[%s1492_s5 + $0x18] sm:$0xff]   ;;  %s1347_s5 = smov [#allocation5]  }
  0x3d   :  { %s986_s18 = sshll.u32 %s1347_s5, 4  ;;  %s987_s18 = int_to_ptr.vmem [resolvable:$true] %s986_s18 }
  0x3e   :  { %1124 = vmatpush3.bf16.msra.mxu0 %v1259_v60  ;;  %v1060_v60 = vld [vmem:[%s1491_s4] ss:$0 sm:$0xff]  ;;  %s1315_s4 = scalar_lea.vmem %s987_s18, 16  ;;  %s1319_s19 = scalar_lea.vmem %s987_s18, 32 }
  0x3f   :  { %1125 = vmatprep.subr.bf16.mxu0 %v1261_v62  ;;  %1146 = vmatpush3.bf16.msra.mxu1 %v1260_v61  ;;  %p1316_p8 = scmp.ne.s32.totalorder %s987_s18, %s1315_s4  ;;  %p1320_p9 = scmp.lt.s32.totalorder %s987_s18, %s987_s18 }
  0x40   :  { %1147 = vmatprep.subr.bf16.mxu1 %v1262_v63  ;;  %p1321_p10 = scmp.lt.s32.totalorder %s1319_s19, %s1315_s4 }
  0x42   :  { %1126 = vmatpush3.bf16.msra.mxu0 %v1263_v0  ;;  %p1322_p11 = por %p1321_p10, %p1320_p9 }
  0x43   :  { %1127 = vmatprep.subr.bf16.mxu0 %v1265_v2  ;;  %1148 = vmatpush3.bf16.msra.mxu1 %v1264_v1 }
  0x44   :  { %1149 = vmatprep.subr.bf16.mxu1 %v1266_v3  ;;  %p1323_p12 = pnand %p1322_p11, %p1316_p8 }
  0x46   :  { %1128 = vmatpush3.bf16.msra.mxu0 %v1267_v4  ;;  %v1069_v4 = vld [vmem:[%s1493_s6] ss:$0 sm:$0xff] }
  0x47   :  { %1129 = vmatprep.subr.bf16.mxu0 %v1269_v6  ;;  %1150 = vmatpush3.bf16.msra.mxu1 %v1268_v5 }
  0x48   :  { %1151 = vmatprep.subr.bf16.mxu1 %v1270_v7 }
  0x4a   :  { %1130 = vmatpush3.bf16.msra.mxu0 %v1271_v8 }
  0x4b   :  { %1131 = vmatprep.subr.bf16.mxu0 %v1273_v10  ;;  %1152 = vmatpush3.bf16.msra.mxu1 %v1272_v9 }
  0x4c   :  { %1153 = vmatprep.subr.bf16.mxu1 %v1274_v11 }
  0x4e   :  { %1132 = vmatpush3.bf16.msra.mxu0 %v1275_v12 }
  0x4f   :  { %1133 = vmatprep.subr.bf16.mxu0 %v1277_v14  ;;  %1154 = vmatpush3.bf16.msra.mxu1 %v1276_v13 }
  0x50   :  { %1155 = vmatprep.subr.bf16.mxu1 %v1278_v15 }
  0x52   :  { %1134 = vmatpush3.bf16.msra.mxu0 %v1279_v16 }
  0x53   :  { %1156 = vmatpush3.bf16.msra.mxu1 %v1280_v17  ;;  %1177 = vmatprep.subr.bf16.mxu0 %v1345_v21 }
  0x54   :  { %1197 = vmatprep.subr.bf16.mxu1 %v1345_v21 }
  0x55   :  { %733 = vmatmul.mubr.bf16.vlgmr.msra.gmra.mrb[4].mxu0 %v209_v18 }
  0x56   :  { %773 = vmatmul.mubr.bf16.vlgmr.msra.gmra.mrb[4].mxu1 %v225_v19  ;;  %1178 = vmatpush3.bf16.msra.mxu0 %v1281_v20 }
  0x57   :  { %1179 = vmatprep.subr.bf16.mxu0 %v1345_v21  ;;  %1193 = vmatprep.mubr.msk.bf16.mxu0 %vm1346_vm0, %v1345_v21 }
  0x58   :  { %1205 = vmatprep.mubr.msk.bf16.mxu1 %vm1346_vm0, %v1345_v21  ;;  %1198 = vmatpush3.bf16.msra.mxu1 %v1289_v29 }
  0x59   :  { %1199 = vmatprep.subr.bf16.mxu1 %v1345_v21 }
  0x5a   :  { %1180 = vmatpush3.bf16.msra.mxu0 %v1282_v22 }
  0x5b   :  { %1181 = vmatprep.subr.bf16.mxu0 %v1345_v21 }
  0x5c   :  { %1200 = vmatpush3.bf16.msra.mxu1 %v1290_v30 }
  0x5d   :  { %1201 = vmatprep.subr.bf16.mxu1 %v1345_v21 }
  0x5e   :  { %1182 = vmatpush3.bf16.msra.mxu0 %v1283_v23 }
  0x5f   :  { %1183 = vmatprep.subr.bf16.mxu0 %v1345_v21 }
  0x60   :  { %1202 = vmatpush3.bf16.msra.mxu1 %v1291_v58 }
  0x61   :  { %1203 = vmatprep.subr.bf16.mxu1 %v1345_v21 }
  0x62   :  { %1184 = vmatpush3.bf16.msra.mxu0 %v1284_v24 }
  0x63   :  { %1185 = vmatprep.subr.bf16.mxu0 %v1345_v21 }
  0x64   :  { %1204 = vmatpush3.bf16.msra.mxu1 %v1292_v59 }
  0x66   :  { %1186 = vmatpush3.bf16.msra.mxu0 %v1285_v25 }
  0x67   :  { %1187 = vmatprep.subr.bf16.mxu0 %v1345_v21 }
  0x6a   :  { %1188 = vmatpush3.bf16.msra.mxu0 %v1286_v26 }
  0x6b   :  { %1189 = vmatprep.subr.bf16.mxu0 %v1345_v21 }
  0x6e   :  { %1190 = vmatpush3.bf16.msra.mxu0 %v1287_v27 }
  0x6f   :  { %1191 = vmatprep.subr.bf16.mxu0 %v1345_v21 }
  0x72   :  { %1192 = vmatpush3.bf16.msra.mxu0 %v1288_v28 }
 0x108   :  { %v1091_v31 = vpop.f32.mrb[0].mxu0 }
 0x109   :  { %v1092_v33 = vpop.f32.mrb[1].mxu0  ;;  %v1113_v34 = vpop.f32.mrb[0].mxu1 }
 0x10a   :  { %v1093_v35 = vadd.f32 %v1092_v33, %v1091_v31  ;;  %v1094_v36 = vpop.f32.mrb[2].mxu0  ;;  %v1114_v37 = vpop.f32.mrb[1].mxu1 }
 0x10b   :  { %v1095_v38 = vpop.f32.mrb[3].mxu0  ;;  %v1115_v40 = vadd.f32 %v1114_v37, %v1113_v34  ;;  %v1116_v41 = vpop.f32.mrb[2].mxu1 }
 0x10c   :  { %v655_v39 = vadd.f32 %v1093_v35, %v995_v32  ;;  %v1117_v42 = vpop.f32.mrb[3].mxu1 }
 0x10e   :  { %v695_v43 = vadd.f32 %v1115_v40, %v655_v39 }
 0x128   :  { %v1135_v44 = vpop.f32.mrb[4].mxu0 }
 0x129   :  { %v1136_v45 = vpop.f32.mrb[5].mxu0  ;;  %v1157_v46 = vpop.f32.mrb[4].mxu1 }
 0x12a   :  { %v1137_v47 = vadd.f32 %v1136_v45, %v1135_v44  ;;  %v1138_v48 = vpop.f32.mrb[6].mxu0  ;;  %v1158_v49 = vpop.f32.mrb[5].mxu1 }
 0x12b   :  { %v1139_v50 = vpop.f32.mrb[7].mxu0  ;;  %v1159_v52 = vadd.f32 %v1158_v49, %v1157_v46  ;;  %v1160_v53 = vpop.f32.mrb[6].mxu1 }
 0x12c   :  { %v735_v51 = vadd.f32 %v1137_v47, %v695_v43  ;;  %v1161_v54 = vpop.f32.mrb[7].mxu1 }
 0x12e   :  { %v775_v55 = vadd.f32 %v1159_v52, %v735_v51 }
 0x130   :  { %v780_v56 = vmax.f32 %v775_v55, 0.0 }
 0x132   :  { %v781_v57 = vpack.c.bf16 %v780_v56, %v780_v56 }
 0x134   :  { %1194 = vmatmul.mubr.bf16.vlgmr.msra.gmra.mrb[8].mxu0 %v781_v57 }
 0x207   :  { %v887_v61 = vpop.f32.mrb[8].mxu0 }
 0x208   :  { %v888_v62 = vadd.f32 %v1060_v60, %v887_v61  ;;  %v1195_v63 = vpop.f32.mrb[9].mxu0 }
 0x209   :  { %v890_v0 = vpop.f32.mrb[10].mxu0 }
 0x20a   :  { %v893_v1 = vmax.f32 %v888_v62, 0.0  ;;  %v1196_v2 = vpop.f32.mrb[11].mxu0 }
 0x20c   :  { %v894_v3 = vpack.c.bf16 %v893_v1, %v893_v1 }
 0x20e   :  { %1206 = vmatmul.mubr.msk.bf16.vlgmr.msra.gmra.mrb[8].mxu1 %vm934_vm1, %v894_v3 }
 0x2e1   :  { %v972_v5 = vpop.f32.mrb[8].mxu1 }
 0x2e2   :  { %v973_v6 = vadd.f32 %v1069_v4, %v972_v5  ;;  %v1207_v7 = vpop.f32.mrb[9].mxu1 }
 0x2e3   :  { %v975_v8 = vpop.f32.mrb[10].mxu1 }
 0x2e4   :  { %v978_v9 = vpack.c.bf16 %v973_v6, %v973_v6  ;;  %v1208_v10 = vpop.f32.mrb[11].mxu1 }
 0x2e6   :  { %979 = vst [vmem:[#allocation5] sm:$0x1] %v978_v9 }
 0x2e7   :  { %1326 = shalt.err (!%p1323_p12)
}
 0x2e8   :  { %s1327_s21 = scalar_lea.hbm %s1494_s7, 16 }
 0x2e9   :  { %p1328_p13 = scmp.ne.s32.totalorder %s1494_s7, %s1327_s21  ;;  %p1331_p0 = scmp.lt.u32.totalorder %s1327_s21, %s1494_s7 }
 0x2eb   :  { %p1333_p1 = pnand %p1331_p0, %p1328_p13 }
 0x2ed   :  { %1336 = shalt.err (!%p1333_p1)
}
 0x2ee   :  { %989 = dma.vmem_to_hbm [thread:$0]  %s987_s18, 16, %s1494_s7, [#allocation4]  }
 0x2ef   :  { %1339 = dma.done.wait [#allocation4], 16  }
 0x2f0   :  { %1340 = vsyncadd [#allocation4], 4294967280 }
 0x2f1   :  { %993 = vsyncpa [#allocation3], 1 }
 0x2f2   :  { %994 = vsyncpa [#allocation4], 1 }

</bundles_post_ra>
